<compile_context>
chip_gen: v5e
topology: v5e:2x2
jax: 0.10.0
libtpu: 0.0.40
codegen_flags: <defaults>
</compile_context>

<pallas_src>
import functools

import jax
import jax.numpy as jnp
from jax.experimental import pallas as pl
from jax.experimental.pallas import tpu as pltpu

VAR_EPS = 1e-3  # matches gcn.forward var_eps


# ---------------------------------------------------------------------------
# Hardware query (defensive: falls back to conservative constants)
# ---------------------------------------------------------------------------
def _tpu_info():
    """Returns (physical VMEM bytes per TensorCore, is_dual_tensorcore_chip)."""
    kind = ""
    try:
        kind = str(jax.devices()[0].device_kind).lower()
    except Exception:
        pass
    dual_tc = "v7" in kind
    vmem = 0
    try:
        vmem = int(pltpu.get_tpu_info().vmem_capacity_bytes)
    except Exception:
        vmem = 0
    if vmem <= 0:
        # v7x: 64 MiB per TC; v5e / v6e: 128 MiB.
        vmem = (64 if dual_tc else 128) * 1024 * 1024
    return vmem, dual_tc


def _pick_batch_tile(B, C_in, C_mid, C_out, N, itemsize, block_budget, min_steps):
    """Largest batch tile fitting the VMEM block budget, capped so the grid
    keeps >= min_steps steps (DMA/compute pipelining on 1-TC chips, TensorCore
    load balance on v7x)."""
    c_max = max(C_in, C_mid, C_out)
    # weights + biases (double-buffered but tiny; counted once).
    w_bytes = (C_mid * C_in + C_out * C_mid) * itemsize + (C_mid + C_out) * 4
    # f32 temporaries live inside the per-sample loop (h, centered copy, residual).
    tmp_bytes = 5 * c_max * N * 4
    # x block + out block, each double-buffered by the Pallas pipeline.
    per_sample = 2 * (C_in + C_out) * N * itemsize
    bt = (block_budget - w_bytes - tmp_bytes) // max(per_sample, 1)
    bt = max(1, min(int(bt), B, B // min_steps))
    return bt


# ---------------------------------------------------------------------------
# Kernels
# ---------------------------------------------------------------------------
def _gcn(h, n):
    """Global-context norm over the point axis.  Two-pass, unbiased (n-1)
    variance -> matches torch.var / the reference numerics."""
    m = jnp.sum(h, axis=-1, keepdims=True) * (1.0 / n)
    d = h - m
    # max(n-1, 1) guards n == 1 (torch.var would return NaN there).
    v = jnp.sum(d * d, axis=-1, keepdims=True) * (1.0 / max(n - 1, 1))
    return d * jax.lax.rsqrt(v + VAR_EPS)


def _resnet_kernel_gcn(x_ref, w01_ref, b01_ref, w2_ref, b2_ref, o_ref, *, n_points):
    """Per-sample: (preconv∘conv1) -> gcn -> conv2 -> gcn -> relu -> residual.

    The batch tile is iterated in-kernel so every conv is a canonical 2-D
    (C_out, C_in) x (C_in, N) MXU matmul: no weight broadcasts, no relayouts.
    """
    bt = x_ref.shape[0]

    @pl.loop(0, bt)
    def _(b):
        x = x_ref[b]                                            # (C_in, N)
        h = jnp.dot(w01_ref[...], x,
                    preferred_element_type=jnp.float32) + b01_ref[...]
        h = _gcn(h, n_points)
        # h is unit-scale after gcn; feed the MXU in the weight dtype and keep
        # the accumulator in f32.
        w2 = w2_ref[...]
        h = jnp.dot(w2, h.astype(w2.dtype),
                    preferred_element_type=jnp.float32) + b2_ref[...]
        h = _gcn(h, n_points)
        out = jnp.maximum(h, 0.0) + x.astype(jnp.float32)       # relu + residual
        o_ref[b] = out.astype(o_ref.dtype)


def _resnet_kernel_nogcn(x_ref, w_ref, b_ref, o_ref):
    """All three convs composed in the wrapper -> one matmul -> relu -> residual."""
    bt = x_ref.shape[0]

    @pl.loop(0, bt)
    def _(b):
        x = x_ref[b]
        h = jnp.dot(w_ref[...], x,
                    preferred_element_type=jnp.float32) + b_ref[...]
        o_ref[b] = (jnp.maximum(h, 0.0) + x.astype(jnp.float32)).astype(o_ref.dtype)


# ---------------------------------------------------------------------------
# Wrapper
# ---------------------------------------------------------------------------
def conv1d_resnet_block(x, wpre, bpre, w1, b1, w2, b2, *, perform_gcn=True):
    """x: (B, C_in, N); weights (C_out, C_in); biases (C_out, 1)."""
    B, C_in, N = x.shape
    C_mid = wpre.shape[0]
    C_out = w2.shape[0]
    assert C_out == C_in, "residual connection requires out_channel == in_channel"

    f32 = jnp.float32
    # --- compose preconv + conv1 (exact: nothing between them) ---------------
    w01 = jnp.dot(w1.astype(f32), wpre.astype(f32))                   # (C_mid, C_in)
    b01 = jnp.dot(w1.astype(f32), bpre.astype(f32)) + b1.astype(f32)  # (C_mid, 1)
    if not perform_gcn:
        # no gcn anywhere -> all three convs compose into a single matmul.
        w_all = jnp.dot(w2.astype(f32), w01)                          # (C_out, C_in)
        b_all = jnp.dot(w2.astype(f32), b01) + b2.astype(f32)         # (C_out, 1)

    # --- per-generation VMEM budgeting & batch tiling -------------------------
    vmem_phys, dual_tc = _tpu_info()
    vmem_limit = int(min(vmem_phys // 2, 96 * 1024 * 1024))  # 64 MiB on v5e/v6e
    if dual_tc:
        vmem_limit = min(vmem_limit, 32 * 1024 * 1024)       # 32 MiB scoped on v7x
    block_budget = (vmem_limit * 3) // 4                     # ~25% headroom
    min_steps = 4 if dual_tc else 2
    bt = _pick_batch_tile(B, C_in, C_mid, C_out, N, x.dtype.itemsize,
                          block_budget, min_steps)
    # TODO(synk): add an N-tiling fallback (two-pass gcn stats accumulated over
    # N tiles via pl.when init/finalize) for single samples whose full-N
    # working set exceeds the VMEM budget.

    grid = (pl.cdiv(B, bt),)   # ragged last batch block handled by Pallas; no pad.

    # Full-dim blocks on the last two axes (legal for any C / N); output keeps
    # N on lanes so stores stay dense except a masked tail tile if N % 128 != 0.
    x_spec = pl.BlockSpec((bt, C_in, N), lambda i: (i, 0, 0))
    o_spec = pl.BlockSpec((bt, C_out, N), lambda i: (i, 0, 0))

    def full_spec(shape):
        return pl.BlockSpec(shape, lambda i: (0,) * len(shape))

    compiler_params = pltpu.CompilerParams(
        dimension_semantics=("parallel",),
        vmem_limit_bytes=vmem_limit,
    )
    out_shape = jax.ShapeDtypeStruct((B, C_out, N), x.dtype)

    if perform_gcn:
        kern = functools.partial(_resnet_kernel_gcn, n_points=N)
        return pl.pallas_call(
            kern,
            out_shape=out_shape,
            grid_spec=pltpu.PrefetchScalarGridSpec(
                num_scalar_prefetch=0,
                grid=grid,
                in_specs=[
                    x_spec,
                    full_spec((C_mid, C_in)), full_spec((C_mid, 1)),
                    full_spec((C_out, C_mid)), full_spec((C_out, 1)),
                ],
                out_specs=o_spec,
            ),
            compiler_params=compiler_params,
        )(x, w01.astype(x.dtype), b01, w2.astype(x.dtype), b2.astype(f32))

    return pl.pallas_call(
        _resnet_kernel_nogcn,
        out_shape=out_shape,
        grid_spec=pltpu.PrefetchScalarGridSpec(
            num_scalar_prefetch=0,
            grid=grid,
            in_specs=[x_spec, full_spec((C_out, C_in)), full_spec((C_out, 1))],
            out_specs=o_spec,
        ),
        compiler_params=compiler_params,
    )(x, w_all.astype(x.dtype), b_all)


# ---------------------------------------------------------------------------
# Pure-JAX reference (mirrors the PyTorch forward, two-pass unbiased variance)
# ---------------------------------------------------------------------------
def _gcn_ref(h):
    n = h.shape[-1]
    m = jnp.mean(h, axis=-1, keepdims=True)
    v = jnp.sum((h - m) ** 2, axis=-1, keepdims=True) / (n - 1)
    return (h - m) * jax.lax.rsqrt(v + VAR_EPS)


def reference(x, wpre, bpre, w1, b1, w2, b2, *, perform_gcn=True):
    f32 = jnp.float32
    xf = x.astype(f32)
    h = jnp.einsum('oi,bin->bon', wpre.astype(f32), xf) + bpre.astype(f32)[None]
    h = jnp.einsum('oi,bin->bon', w1.astype(f32), h) + b1.astype(f32)[None]
    if perform_gcn:
        h = _gcn_ref(h)
    h = jnp.einsum('oi,bin->bon', w2.astype(f32), h) + b2.astype(f32)[None]
    if perform_gcn:
        h = _gcn_ref(h)
    return (jnp.maximum(h, 0.0) + xf).astype(x.dtype)


# ---------------------------------------------------------------------------
# Self-test
# ---------------------------------------------------------------------------
if __name__ == "__main__":
    key = jax.random.PRNGKey(0)

    def make_params(key, c_in, c_mid, c_out):
        k0, k1, k2, k3, k4, k5 = jax.random.split(key, 6)
        wpre = jax.random.normal(k0, (c_mid, c_in), dtype=jnp.float32) * 0.3
        bpre = jax.random.normal(k1, (c_mid, 1), dtype=jnp.float32) * 0.1
        w1 = jax.random.normal(k2, (c_mid, c_mid), dtype=jnp.float32) * 0.3
        b1 = jax.random.normal(k3, (c_mid, 1), dtype=jnp.float32) * 0.1
        w2 = jax.random.normal(k4, (c_out, c_mid), dtype=jnp.float32) * 0.3
        b2 = jax.random.normal(k5, (c_out, 1), dtype=jnp.float32) * 0.1
        return wpre, bpre, w1, b1, w2, b2

    def check(key, B, C, N, perform_gcn):
        kx, kp = jax.random.split(key)
        x = jax.random.normal(kx, (B, C, N), dtype=jnp.float32)
        params = make_params(kp, C, C, C)
        out = conv1d_resnet_block(x, *params, perform_gcn=perform_gcn)
        out = jax.block_until_ready(out)
        ref = reference(x, *params, perform_gcn=perform_gcn)
        assert out.shape == (B, C, N)
        err = jnp.max(jnp.abs(out - ref))
        assert jnp.allclose(out, ref, atol=2e-4, rtol=2e-4), \
            f"max abs err {err} (B={B}, C={C}, N={N}, gcn={perform_gcn})"

    k1, k2, k3 = jax.random.split(key, 3)
    # 1) small case: lane-dense N, even batch split.
    check(k1, B=2, C=8, N=128, perform_gcn=True)
    # 2) ragged batch block (cdiv grid) + N not a multiple of 128 (masked tail stores).
    check(k2, B=5, C=8, N=200, perform_gcn=True)
    # 3) gcn off -> all three convs composed into a single matmul.
    check(k3, B=4, C=8, N=128, perform_gcn=False)

    print("KERNEL_OK")
</pallas_src>

<mosaic_0001>
module attributes {stable_mosaic.version = 11 : i64} {
  func.func @_resnet_kernel_gcn(%arg0: i32, %arg1: memref<1x8x128xf32, #tpu.memory_space<vmem>>, %arg2: memref<8x8xf32, #tpu.memory_space<vmem>>, %arg3: memref<8x1xf32, #tpu.memory_space<vmem>>, %arg4: memref<8x8xf32, #tpu.memory_space<vmem>>, %arg5: memref<8x1xf32, #tpu.memory_space<vmem>>, %arg6: memref<1x8x128xf32, #tpu.memory_space<vmem>>) attributes {dimension_semantics = [#tpu.dimension_semantics<parallel>], iteration_bounds = array<i64: 2>, scalar_prefetch = 0 : i64, scratch_operands = 0 : i64, tpu.core_type = #tpu.core_type<tc>, window_params = [{transform_indices = @transform_0, window_bounds = array<i64: 1, 8, 128>}, {pipeline_mode = #tpu.pipeline_mode<synchronous>, transform_indices = @transform_1, window_bounds = array<i64: 8, 8>}, {pipeline_mode = #tpu.pipeline_mode<synchronous>, transform_indices = @transform_2, window_bounds = array<i64: 8, 1>}, {pipeline_mode = #tpu.pipeline_mode<synchronous>, transform_indices = @transform_3, window_bounds = array<i64: 8, 8>}, {pipeline_mode = #tpu.pipeline_mode<synchronous>, transform_indices = @transform_4, window_bounds = array<i64: 8, 1>}, {transform_indices = @transform_5, window_bounds = array<i64: 1, 8, 128>}]} {
    %c0_i32 = arith.constant 0 : i32
    %c1_i32 = arith.constant 1 : i32
    %0 = arith.muli %c0_i32, %c1_i32 : i32
    %c0_i32_0 = arith.constant 0 : i32
    %1 = arith.addi %c0_i32_0, %0 : i32
    %2 = arith.index_cast %1 : i32 to index
    %c0 = arith.constant 0 : index
    %c0_1 = arith.constant 0 : index
    %3 = vector.load %arg1[%2, %c0, %c0_1] : memref<1x8x128xf32, #tpu.memory_space<vmem>>, vector<1x8x128xf32>
    %4 = vector.shape_cast %3 : vector<1x8x128xf32> to vector<8x128xf32>
    %c0_2 = arith.constant 0 : index
    %c0_3 = arith.constant 0 : index
    %5 = vector.load %arg2[%c0_2, %c0_3] : memref<8x8xf32, #tpu.memory_space<vmem>>, vector<8x8xf32>
    %cst = arith.constant dense<0.000000e+00> : vector<8x128xf32>
    %6 = tpu.matmul %5, %4, %cst {dimension_numbers = #tpu.dot_dimension_numbers<[1], [0], [0], [1], [0, 0, 1, 1], [], []>} : vector<8x8xf32>, vector<8x128xf32>, vector<8x128xf32> -> vector<8x128xf32>
    %c0_4 = arith.constant 0 : index
    %c0_5 = arith.constant 0 : index
    %7 = vector.load %arg3[%c0_4, %c0_5] : memref<8x1xf32, #tpu.memory_space<vmem>>, vector<8x1xf32>
    %8 = vector.broadcast %7 : vector<8x1xf32> to vector<8x128xf32>
    %9 = arith.addf %6, %8 : vector<8x128xf32>
    %cst_6 = arith.constant dense<0.000000e+00> : vector<8xf32>
    %10 = vector.multi_reduction <add>, %9, %cst_6 [1] : vector<8x128xf32> to vector<8xf32>
    %11 = vector.shape_cast %10 : vector<8xf32> to vector<8x1xf32>
    %cst_7 = arith.constant 7.812500e-03 : f32
    %12 = vector.broadcast %cst_7 : f32 to vector<8x1xf32>
    %13 = arith.mulf %11, %12 : vector<8x1xf32>
    %14 = vector.broadcast %13 : vector<8x1xf32> to vector<8x128xf32>
    %15 = arith.subf %9, %14 : vector<8x128xf32>
    %16 = arith.mulf %15, %15 : vector<8x128xf32>
    %cst_8 = arith.constant dense<0.000000e+00> : vector<8xf32>
    %17 = vector.multi_reduction <add>, %16, %cst_8 [1] : vector<8x128xf32> to vector<8xf32>
    %18 = vector.shape_cast %17 : vector<8xf32> to vector<8x1xf32>
    %cst_9 = arith.constant 0.00787401571 : f32
    %19 = vector.broadcast %cst_9 : f32 to vector<8x1xf32>
    %20 = arith.mulf %18, %19 : vector<8x1xf32>
    %cst_10 = arith.constant 1.000000e-03 : f32
    %21 = vector.broadcast %cst_10 : f32 to vector<8x1xf32>
    %22 = arith.addf %20, %21 : vector<8x1xf32>
    %23 = math.rsqrt %22 : vector<8x1xf32>
    %24 = vector.broadcast %23 : vector<8x1xf32> to vector<8x128xf32>
    %25 = arith.mulf %15, %24 : vector<8x128xf32>
    %c0_11 = arith.constant 0 : index
    %c0_12 = arith.constant 0 : index
    %26 = vector.load %arg4[%c0_11, %c0_12] : memref<8x8xf32, #tpu.memory_space<vmem>>, vector<8x8xf32>
    %cst_13 = arith.constant dense<0.000000e+00> : vector<8x128xf32>
    %27 = tpu.matmul %26, %25, %cst_13 {dimension_numbers = #tpu.dot_dimension_numbers<[1], [0], [0], [1], [0, 0, 1, 1], [], []>} : vector<8x8xf32>, vector<8x128xf32>, vector<8x128xf32> -> vector<8x128xf32>
    %c0_14 = arith.constant 0 : index
    %c0_15 = arith.constant 0 : index
    %28 = vector.load %arg5[%c0_14, %c0_15] : memref<8x1xf32, #tpu.memory_space<vmem>>, vector<8x1xf32>
    %29 = vector.broadcast %28 : vector<8x1xf32> to vector<8x128xf32>
    %30 = arith.addf %27, %29 : vector<8x128xf32>
    %cst_16 = arith.constant dense<0.000000e+00> : vector<8xf32>
    %31 = vector.multi_reduction <add>, %30, %cst_16 [1] : vector<8x128xf32> to vector<8xf32>
    %32 = vector.shape_cast %31 : vector<8xf32> to vector<8x1xf32>
    %cst_17 = arith.constant 7.812500e-03 : f32
    %33 = vector.broadcast %cst_17 : f32 to vector<8x1xf32>
    %34 = arith.mulf %32, %33 : vector<8x1xf32>
    %35 = vector.broadcast %34 : vector<8x1xf32> to vector<8x128xf32>
    %36 = arith.subf %30, %35 : vector<8x128xf32>
    %37 = arith.mulf %36, %36 : vector<8x128xf32>
    %cst_18 = arith.constant dense<0.000000e+00> : vector<8xf32>
    %38 = vector.multi_reduction <add>, %37, %cst_18 [1] : vector<8x128xf32> to vector<8xf32>
    %39 = vector.shape_cast %38 : vector<8xf32> to vector<8x1xf32>
    %cst_19 = arith.constant 0.00787401571 : f32
    %40 = vector.broadcast %cst_19 : f32 to vector<8x1xf32>
    %41 = arith.mulf %39, %40 : vector<8x1xf32>
    %cst_20 = arith.constant 1.000000e-03 : f32
    %42 = vector.broadcast %cst_20 : f32 to vector<8x1xf32>
    %43 = arith.addf %41, %42 : vector<8x1xf32>
    %44 = math.rsqrt %43 : vector<8x1xf32>
    %45 = vector.broadcast %44 : vector<8x1xf32> to vector<8x128xf32>
    %46 = arith.mulf %36, %45 : vector<8x128xf32>
    %cst_21 = arith.constant 0.000000e+00 : f32
    %47 = vector.broadcast %cst_21 : f32 to vector<8x128xf32>
    %48 = arith.maximumf %46, %47 : vector<8x128xf32>
    %49 = arith.addf %48, %4 : vector<8x128xf32>
    %50 = arith.index_cast %1 : i32 to index
    %c0_22 = arith.constant 0 : index
    %c0_23 = arith.constant 0 : index
    %51 = vector.load %arg6[%50, %c0_22, %c0_23] : memref<1x8x128xf32, #tpu.memory_space<vmem>>, vector<1x8x128xf32>
    %52 = vector.shape_cast %51 : vector<1x8x128xf32> to vector<8x128xf32>
    %53 = vector.shape_cast %49 : vector<8x128xf32> to vector<1x8x128xf32>
    tpu.vector_store %arg6[%50, %c0_22, %c0_23], %53 {strides = array<i32>} : memref<1x8x128xf32, #tpu.memory_space<vmem>>, vector<1x8x128xf32>,
    %c1_i32_24 = arith.constant 1 : i32
    return
  }
  func.func @transform_0(%arg0: i32) -> (i32, i32, i32) {
    %c0_i32 = arith.constant 0 : i32
    %c0_i32_0 = arith.constant 0 : i32
    %c0_i32_1 = arith.constant 0 : i32
    return %arg0, %c0_i32, %c0_i32_0 : i32, i32, i32
  }
  func.func @transform_1(%arg0: i32) -> (i32, i32) {
    %c0_i32 = arith.constant 0 : i32
    %c0_i32_0 = arith.constant 0 : i32
    %c0_i32_1 = arith.constant 0 : i32
    return %c0_i32, %c0_i32_0 : i32, i32
  }
  func.func @transform_2(%arg0: i32) -> (i32, i32) {
    %c0_i32 = arith.constant 0 : i32
    %c0_i32_0 = arith.constant 0 : i32
    %c0_i32_1 = arith.constant 0 : i32
    return %c0_i32, %c0_i32_0 : i32, i32
  }
  func.func @transform_3(%arg0: i32) -> (i32, i32) {
    %c0_i32 = arith.constant 0 : i32
    %c0_i32_0 = arith.constant 0 : i32
    %c0_i32_1 = arith.constant 0 : i32
    return %c0_i32, %c0_i32_0 : i32, i32
  }
  func.func @transform_4(%arg0: i32) -> (i32, i32) {
    %c0_i32 = arith.constant 0 : i32
    %c0_i32_0 = arith.constant 0 : i32
    %c0_i32_1 = arith.constant 0 : i32
    return %c0_i32, %c0_i32_0 : i32, i32
  }
  func.func @transform_5(%arg0: i32) -> (i32, i32, i32) {
    %c0_i32 = arith.constant 0 : i32
    %c0_i32_0 = arith.constant 0 : i32
    %c0_i32_1 = arith.constant 0 : i32
    return %arg0, %c0_i32, %c0_i32_0 : i32, i32, i32
  }
}

</mosaic_0001>

<bundles_post_ra>
// kernel: tpu_custom_call.1
= control target key start
LH: loop header
LB: loop body
LE: loop exit
PB: predicated region body
PF: predicated region fallthrough
CT: control target
= control target key end

     0   :  { %10 = vsyncpa [#allocation3], 0  ;;  %s822_s0 = inlined_call_operand.vmem [shape: f32[2,8,128], index: 0, kind: input, shape index: {}]   ;;  %s823_s1 = inlined_call_operand.hbm [shape: f32[8,8], index: 1, kind: input, shape index: {}]   ;;  %s824_s2 = inlined_call_operand.vmem [shape: f32[8,1], index: 2, kind: input, shape index: {}]   ;;  %s825_s3 = inlined_call_operand.hbm [shape: f32[8,8], index: 3, kind: input, shape index: {}]   ;;  %s826_s4 = inlined_call_operand.vmem [shape: f32[8,1], index: 4, kind: input, shape index: {}]   ;;  %s827_s5 = inlined_call_operand.hbm [shape: f32[2,8,128], index: 5, kind: output, shape index: {}]  }
   0x1   :  { %11 = vsyncpa [#allocation6], 0 }
   0x2   :  { %12 = vsyncpa [#allocation4], 0 }
   0x3   :  { %14 = vsyncpa [#allocation4 + $0x1], 0  ;;  %s700_s18 = smov 0   ;;  %s702_s19 = smov 0  }
   0x4   :  { %s704_s20 = smov 0   ;;  %s706_s21 = smov 0  }
   0x5 LB: > { %s721_s22 = sadd.s32 4294967295, %s665_s21   ;;  %s452_s23 = sadd.s32 4294967294, %s665_s21   ;;  %s665_s21 = sphi %s706_s21, %s834_s21   ;;  %s661_s20 = sphi %s704_s20, %s833_s20   ;;  %s657_s19 = sphi %s702_s19, %s832_s19   ;;  %s653_s18 = sphi %s700_s18, %s831_s18  }
   0x6   : > { %s725_s24 = sadd.s32 1, %s665_s21   ;;  %s137_s25 = sadd.s32 1, %s661_s20 }
   0x7   : > { %s134_s26 = ssub.s32 %s665_s21, %s725_s24  ;;  %p147_p0 = scmp.ne.s32.totalorder %s661_s20, %s657_s19 }
   0x8   : > { %p135_p1 = scmp.eq.s32.totalorder %s134_s26, 0  ;;  %p148_p2 = scmp.eq.s32.totalorder %s721_s22, 1 }
   0x9   : > { %p153_p3 = scmp.ne.s32.totalorder %s657_s19, %s653_s18  ;;  %p154_p4 = scmp.eq.s32.totalorder %s452_s23, 1 }
   0xa   : > { %s736_s27 = scalar_select %p135_p1, %s661_s20, %s137_s25  }
   0xb   : > { %p738_p5 = por %p148_p2, %p147_p0  ;;  %p742_p6 = por %p154_p4, %p153_p3 }
   0xc   : > { %p453_p7 = scmp.ge.s32.totalorder %s665_s21, 1  ;;  %p161_p8 = scmp.lt.s32.totalorder %s665_s21, 3 }
   0xd   : > { %p489_p9 = scmp.eq.s32.totalorder %s721_s22, 0  ;;  %s173_s8 = sshll.u32 %s823_s1, 4  ;;  %s174_s8 = int_to_ptr.hbm [resolvable:$true] %s173_s8 }
   0xe   : > { %p749_p10 = pnand %p453_p7, %p161_p8  ;;  %s667_s9 = smov [#allocation2]  }
   0xf   : > { %s175_s10 = sshll.u32 %s667_s9, 4  ;;  %s188_s13 = sshll.u32 %s825_s3, 4  ;;  %s176_s10 = int_to_ptr.vmem [resolvable:$true] %s175_s10  ;;  %s189_s13 = int_to_ptr.hbm [resolvable:$true] %s188_s13 }
  0x10   : > { %p478_p11 = pneg %p749_p10  ;;  %s668_s14 = smov [#allocation5]  }
  0x11   : > { %s190_s15 = sshll.u32 %s668_s14, 4  ;;  %213 = sbr.rel (%p749_p10) target bundleno = 821 (0x335), region = 40  ;;  %s191_s15 = int_to_ptr.vmem [resolvable:$true] %s190_s15 }
  0x12   : > { %p479_p12 = pnand %p489_p9, %p478_p11 }
  0x14   : > { %481 = dma.hbm_to_vmem [thread:$0]  (!%p479_p12), %s174_s8, 128, %s176_s10, [#allocation3]  }
  0x15   : > { %484 = dma.hbm_to_vmem [thread:$0]  (!%p479_p12), %s189_s13, 128, %s191_s15, [#allocation6]  }
  0x16   : > { %640 = dma.done.wait (%p489_p9), [#allocation3], 128  }
  0x17   : > { %642 = vsyncadd (%p489_p9), [#allocation3], 4294967168 }
  0x18   : > { %644 = dma.done.wait (%p489_p9), [#allocation6], 128  }
  0x19   : > { %646 = vsyncadd (%p489_p9), [#allocation6], 4294967168  ;;  %p246_p13 = scmp.lt.s32.totalorder %s721_s22, 1  ;;  %v669_v0 = vmov 0   ;;  %vm258_vm0 = vcmask 64512   ;;  %v251_v2 = vld [vmem:[#allocation2] sm:$0xff] }
  0x1a   : > { %529 = vset.pattern.permute.xlu0 %v669_v0  ;;  %530 = vset.pattern.permute.xlu1 %v669_v0  ;;  %v252_v3 = vld [vmem:[%s824_s2] sm:$0xff]  ;;  %v302_v23 = vld [vmem:[#allocation5] sm:$0xff]  ;;  %s243_s9 = sand.u32 1, %s657_s19   ;;  %s465_s11 = sshll.u32 %s721_s22, 3 }
  0x1b   : > { %s247_s16 = scalar_select %p246_p13, %s721_s22, 1  ;;  %255 = vperm.xlu0 %529, %v252_v3   ;;  %v303_v11 = vld [vmem:[%s826_s4] sm:$0xff] }
  0x1c   : > { %s460_s10 = sshll.u32 %s243_s9, 3  ;;  %s366_s14 = scalar_lea.hbm %s827_s5, %s465_s11 }
  0x1d   : > { %s461_s17 = sshll.u32 %s247_s16, 3  ;;  %s245_s15 = scalar_lea.vmem [#allocation7], %s460_s10 }
  0x1e   : > { %s249_s26 = scalar_lea.vmem %s822_s0, %s461_s17  ;;  %s368_s16 = sshll.u32 %s245_s15, 4  ;;  %s369_s16 = int_to_ptr.vmem [resolvable:$true] %s368_s16 }
  0x1f   : > { %v778_v1 = vld [vmem:[%s249_s26] sm:$0xff]  ;;  %s370_s17 = sshll.u32 %s366_s14, 4  ;;  %s356_s22 = scalar_lea.sflag [#allocation4], %s243_s9  ;;  %s371_s17 = int_to_ptr.hbm [resolvable:$true] %s370_s17 }
  0x20   : > { %277 = vmatpush.msra.mxu0 %v778_v1  ;;  %s609_s23 = sshra.s32 %s371_s17, 4  ;;  %s615_s6 = scalar_lea.hbm %s827_s5, 16  ;;  %s610_s23 = int_to_ptr.hbm [resolvable:$true] %s609_s23 }
  0x21   : > { %462 = vmatmul.msk.f32.vlgmr.msra.gmra.mxu0 %vm258_vm0, %v251_v2  ;;  %s611_s25 = scalar_lea.hbm %s610_s23, 8  ;;  %p616_p3 = scmp.lt.s32.totalorder %s610_s23, %s827_s5 }
  0x22   : > { %p612_p0 = scmp.ne.s32.totalorder %s610_s23, %s611_s25  ;;  %p617_p4 = scmp.lt.s32.totalorder %s615_s6, %s611_s25 }
  0x24   : > { %p613_p1 = pnand %p612_p0, %p738_p5  ;;  %p618_p7 = por %p617_p4, %p616_p3 }
  0x26   : > { %p614_p2 = pneg %p613_p1 }
  0x28   : > { %p619_p8 = pnand %p618_p7, %p614_p2 }
  0x8d   : > { %v256_v4 = vpop.permute.xlu0 %255 }
  0x9e   : > { %v279_v5 = vpop.f32.mrf.mxu0 }
  0x9f   : > { %v280_v6 = vadd.f32 %v279_v5, %v256_v4 }
  0xa1   : > { %282 = vadd.xlane.f32.xlu0 %v280_v6 }
 0x114   : > { %v283_v7 = vpop.xlane.xlu0 %282 }
 0x115   : > { %v284_v8 = vmul.f32 0.0078125, %v283_v7 }
 0x117   : > { %v285_v9 = vsub.f32 %v280_v6, %v284_v8 }
 0x119   : > { %v286_v10 = vmul.f32 %v285_v9, %v285_v9 }
 0x11b   : > { %287 = vadd.xlane.f32.xlu1 %v286_v10 }
 0x134   : > { %306 = vperm.xlu1 %530, %v303_v11  }
 0x18e   : > { %v288_v12 = vpop.xlane.xlu1 %287 }
 0x18f   : > { %v289_v13 = vmul.f32 0.007874016, %v288_v12 }
 0x191   : > { %v290_v14 = vadd.f32 0.001, %v289_v13 }
 0x193   : > { %531 = vrsqrt.f32 %v290_v14  ;;  %vm297_vm2 = vweird.f32 %v290_v14 }
 0x199   : > { %v532_v15 = vpop.eup %531 }
 0x19a   : > { %v292_v16 = vmul.f32 %v532_v15, %v290_v14  ;;  %vm298_vm1 = vweird.f32 %v532_v15 }
 0x19b   : > { %vm299_vm3 = vmor %vm297_vm2, %vm298_vm1 }
 0x19c   : > { %v293_v17 = vmul.f32 %v532_v15, %v292_v16 }
 0x19e   : > { %v294_v18 = vmul.f32 0.5, %v293_v17 }
 0x1a0   : > { %v295_v19 = vsub.f32 1.5, %v294_v18 }
 0x1a2   : > { %v296_v20 = vmul.f32 %v532_v15, %v295_v19 }
 0x1a4   : > { %v300_v21 = vsel %vm299_vm3, %v532_v15, %v296_v20 }
 0x1a5   : > { %v301_v22 = vmul.f32 %v300_v21, %v285_v9 }
 0x1a6   : > { %v307_v24 = vpop.permute.xlu1 %306 }
 0x1a7   : > { %327 = vmatpush.msra.mxu1 %v301_v22 }
 0x1a8   : > { %463 = vmatmul.msk.f32.vlgmr.msra.gmra.mxu1 %vm258_vm0, %v302_v23 }
 0x225   : > { %v329_v25 = vpop.f32.mrf.mxu1 }
 0x226   : > { %v330_v26 = vadd.f32 %v329_v25, %v307_v24 }
 0x228   : > { %332 = vadd.xlane.f32.xlu2 %v330_v26 }
 0x29b   : > { %v333_v27 = vpop.xlane.xlu2 %332 }
 0x29c   : > { %v334_v28 = vmul.f32 0.0078125, %v333_v27 }
 0x29e   : > { %v335_v29 = vsub.f32 %v330_v26, %v334_v28 }
 0x2a0   : > { %v336_v30 = vmul.f32 %v335_v29, %v335_v29 }
 0x2a2   : > { %337 = vadd.xlane.f32.xlu2 %v336_v30 }
 0x315   : > { %v338_v31 = vpop.xlane.xlu2 %337 }
 0x316   : > { %v339_v32 = vmul.f32 0.007874016, %v338_v31 }
 0x318   : > { %v340_v33 = vadd.f32 0.001, %v339_v32 }
 0x31a   : > { %533 = vrsqrt.f32 %v340_v33  ;;  %vm347_vm5 = vweird.f32 %v340_v33 }
 0x320   : > { %v534_v34 = vpop.eup %533 }
 0x321   : > { %v342_v35 = vmul.f32 %v534_v34, %v340_v33  ;;  %vm348_vm4 = vweird.f32 %v534_v34 }
 0x322   : > { %vm349_vm6 = vmor %vm347_vm5, %vm348_vm4 }
 0x323   : > { %v343_v36 = vmul.f32 %v534_v34, %v342_v35 }
 0x325   : > { %v344_v37 = vmul.f32 0.5, %v343_v36 }
 0x327   : > { %v345_v38 = vsub.f32 1.5, %v344_v37 }
 0x329   : > { %v346_v39 = vmul.f32 %v534_v34, %v345_v38 }
 0x32b   : > { %v350_v40 = vsel %vm349_vm6, %v534_v34, %v346_v39 }
 0x32c   : > { %v351_v41 = vmul.f32 %v350_v40, %v335_v29 }
 0x32e   : > { %v352_v42 = vmax.f32 %v351_v41, 0.0 }
 0x330   : > { %v353_v43 = vadd.f32 %v352_v42, %v778_v1 }
 0x332   : > { %354 = vst [vmem:[%s245_s15] sm:$0xff] %v353_v43 }
 0x333   : > { %622 = shalt.err (!%p619_p8)
}
 0x334   : > { %476 = dma.vmem_to_hbm [thread:$0]  (%p738_p5), %s369_s16, 128, %s371_s17, %s356_s22  }
 0x335 PF: > { %p493_p9 = scmp.ge.s32.totalorder %s665_s21, 2  ;;  %s382_s9 = sand.u32 1, %s653_s18  }
 0x336   : > { %s383_s10 = scalar_lea.sflag [#allocation4], %s382_s9 }
 0x337   : > { %p486_p10 = pnand %p493_p9, %p742_p6 }
 0x339   : > { %p487_p11 = pneg %p486_p10 }
 0x33b   : > { %648 = dma.done.wait (%p487_p11), %s383_s10, 128  }
 0x33c   : > { %650 = vsyncadd (%p487_p11), %s383_s10, 4294967168  ;;  %p17_p12 = scmp.ge.s32.totalorder %s725_s24, 4   ;;  %s831_s18 = smov %s657_s19 }
 0x33d   : > { %s832_s19 = smov %s661_s20  ;;  %s833_s20 = smov %s736_s27 }
 0x33e   : > { %s834_s21 = smov %s725_s24  ;;  %19 = sbr.rel (!%p17_p12) target bundleno = 5 (0x5), region = 84 }
 0x343   :  { %389 = vsyncpa [#allocation3], 1 }
 0x344   :  { %391 = vsyncpa [#allocation3 + $0x1], 1 }
 0x345   :  { %392 = vsyncpa [#allocation6], 1 }
 0x346   :  { %393 = vsyncpa [#allocation4], 1 }
 0x347   :  { %395 = vsyncpa [#allocation4 + $0x1], 1 }

</bundles_post_ra>
